<compile_context>
chip_gen: v6e
topology: v6e:2x2x1
jax: 0.10.0
libtpu: 0.0.40
codegen_flags: <defaults>
</compile_context>

<pallas_src>
import math
import functools

import jax
import jax.numpy as jnp
from jax.experimental import pallas as pl
from jax.experimental.pallas import tpu as pltpu  # noqa: F401  (kept for parity / future tiling)

# ---- small, module-consistent config ----
BATCH = 2
SEQ = 8            # num_tokens (<= context_length)
CONTEXT_LEN = 8
EMB = 32           # emb_dim
HEADS = 4          # n_heads
HEAD_DIM = EMB // HEADS
HIDDEN = 4 * EMB   # FF hidden dim
EPS = 1e-5
# TODO(synk): dropout layers are identity here (eval-mode semantics); training-mode
# stochastic dropout is not implemented in the kernel.

_GELU_C = math.sqrt(2.0 / math.pi)


def _gelu(x):
    # 0.5 * x * (1 + tanh(sqrt(2/pi) * (x + 0.044715 * x^3)))
    return 0.5 * x * (1.0 + jnp.tanh(_GELU_C * (x + 0.044715 * x * x * x)))


def _layernorm(x, scale, shift):
    mean = jnp.mean(x, axis=-1, keepdims=True)
    var = jnp.mean((x - mean) ** 2, axis=-1, keepdims=True)   # unbiased=False
    return scale * ((x - mean) * jax.lax.rsqrt(var + EPS)) + shift


def transformer_block_kernel(x_ref, wqkv_ref, wo_ref, bo_ref,
                             ln1_s_ref, ln1_b_ref, ln2_s_ref, ln2_b_ref,
                             w1_ref, b1_ref, w2_ref, b2_ref,
                             o_ref, *, batch, seq, heads):
    x = x_ref[...]                       # (B*T, E) — whole batch in one shot
    shortcut = x                         # original input; used for BOTH residuals
    emb = x.shape[-1]
    head_dim = emb // heads
    bt = batch * seq

    # ---------------- norm1 + causal multi-head attention ----------------
    h = _layernorm(x, ln1_s_ref[...], ln1_b_ref[...])

    # Fused QKV projection: one MXU matmul instead of three.
    qkv = jnp.dot(h, wqkv_ref[...], preferred_element_type=jnp.float32)  # (B*T, 3E)
    inv_sqrt_d = 1.0 / math.sqrt(head_dim)
    q = qkv[:, 0:emb] * inv_sqrt_d       # fold 1/sqrt(Dh) into q once
    k = qkv[:, emb:2 * emb]
    v = qkv[:, 2 * emb:3 * emb]

    # Heads onto a leading batch axis: (H, B*T, Dh).
    # Only static lane slices + a leading-axis stack (layout-safe; no transposes).
    def split_heads(m2):
        return jnp.stack(
            [m2[:, hh * head_dim:(hh + 1) * head_dim] for hh in range(heads)],
            axis=0)

    qh = split_heads(q)
    kh = split_heads(k)
    vh = split_heads(v)

    # Block-diagonal (per-batch) causal mask over the flattened B*T token axis.
    # Built exactly once per invocation; iotas + compares only (no int division).
    row = jax.lax.broadcasted_iota(jnp.int32, (bt, bt), 0)
    col = jax.lax.broadcasted_iota(jnp.int32, (bt, bt), 1)
    allowed = jnp.zeros((bt, bt), jnp.bool_)
    for bb in range(batch):
        lo, hi = bb * seq, (bb + 1) * seq
        allowed = allowed | (((row >= lo) & (row < hi)) &
                             ((col >= lo) & (col < hi)))
    allowed = allowed & (col <= row)                           # causal within batch
    masked = jnp.logical_not(allowed)[None, :, :]              # (1, BT, BT), True == mask

    # ONE batched scores matmul, ONE masked softmax, ONE batched p @ v.
    scores = jnp.einsum('hqd,hkd->hqk', qh, kh,
                        preferred_element_type=jnp.float32)    # (H, BT, BT)
    scores = jnp.where(masked, -jnp.inf, scores)
    m = jnp.max(scores, axis=-1, keepdims=True)                # diag always allowed -> finite
    e = jnp.exp(scores - m)
    denom = jnp.sum(e, axis=-1, keepdims=True)
    p = e * pl.reciprocal(denom, approx=True)                  # EUP reciprocal
    ctx = jnp.einsum('hqk,hkd->hqd', p, vh,
                     preferred_element_type=jnp.float32)       # (H, BT, Dh)

    # Merge heads back to (B*T, E): simple lane-dim concatenation.
    ctx2 = jnp.concatenate([ctx[hh] for hh in range(heads)], axis=-1)   # (BT, E)

    att = jnp.dot(ctx2, wo_ref[...],
                  preferred_element_type=jnp.float32) + bo_ref[...]
    x1 = att + shortcut                  # first residual (+ identity dropout)

    # ---------------- norm2 + feed-forward ----------------
    h2 = _layernorm(x1, ln2_s_ref[...], ln2_b_ref[...])
    f = jnp.dot(h2, w1_ref[...], preferred_element_type=jnp.float32) + b1_ref[...]
    f = _gelu(f)
    f = jnp.dot(f, w2_ref[...], preferred_element_type=jnp.float32) + b2_ref[...]

    # second residual: adds the ORIGINAL block input (as in the PyTorch code)
    o_ref[...] = (f + shortcut).astype(o_ref.dtype)


def transformer_block(x, params):
    B, T, E = x.shape
    # Fuse Q/K/V weights in the wrapper -> one (E, 3E) MXU operand.
    wqkv = jnp.concatenate([params["wq"], params["wk"], params["wv"]], axis=1)
    ordered = [wqkv, params["wo"], params["bo"],
               params["ln1_s"], params["ln1_b"],
               params["ln2_s"], params["ln2_b"],
               params["w1"], params["b1"], params["w2"], params["b2"]]
    kernel = functools.partial(transformer_block_kernel,
                               batch=B, seq=T, heads=HEADS)
    # Single invocation (no grid): the (B*T, E) slab plus all weights (~90 KB)
    # fit comfortably in VMEM, so there is no per-grid-step pipeline overhead.
    # NOTE: at realistic EMB/HIDDEN/B*T, reintroduce one leading "parallel"
    # grid axis (row blocks) so v7x's two TensorCores both get work, K-tile
    # w1/w2 BlockSpecs, and cast MXU operands to bf16 on v6e/v7x.
    out2 = pl.pallas_call(
        kernel,
        out_shape=jax.ShapeDtypeStruct((B * T, E), x.dtype),
    )(x.reshape(B * T, E), *ordered)
    return out2.reshape(B, T, E)


# ---------------- pure-JAX reference (for correctness check) ----------------
def transformer_block_ref(x, p):
    def ln(h, s, b):
        mean = jnp.mean(h, axis=-1, keepdims=True)
        var = jnp.mean((h - mean) ** 2, axis=-1, keepdims=True)
        return s[0] * (h - mean) / jnp.sqrt(var + EPS) + b[0]

    B, T, E = x.shape
    shortcut = x
    h = ln(x, p["ln1_s"], p["ln1_b"])
    q = h @ p["wq"]
    k = h @ p["wk"]
    v = h @ p["wv"]
    q = q.reshape(B, T, HEADS, HEAD_DIM).transpose(0, 2, 1, 3)
    k = k.reshape(B, T, HEADS, HEAD_DIM).transpose(0, 2, 1, 3)
    v = v.reshape(B, T, HEADS, HEAD_DIM).transpose(0, 2, 1, 3)
    scores = jnp.einsum("bhqd,bhkd->bhqk", q, k)
    mask = jnp.triu(jnp.ones((T, T), bool), k=1)
    scores = jnp.where(mask, -jnp.inf, scores)
    w = jax.nn.softmax(scores / math.sqrt(HEAD_DIM), axis=-1)
    ctx = jnp.einsum("bhqk,bhkd->bhqd", w, v).transpose(0, 2, 1, 3).reshape(B, T, E)
    att = ctx @ p["wo"] + p["bo"][0]
    x1 = att + shortcut
    h2 = ln(x1, p["ln2_s"], p["ln2_b"])
    f = h2 @ p["w1"] + p["b1"][0]
    f = 0.5 * f * (1.0 + jnp.tanh(_GELU_C * (f + 0.044715 * f ** 3)))
    f = f @ p["w2"] + p["b2"][0]
    return f + shortcut


def init_params(key):
    ks = jax.random.split(key, 10)
    s = 0.02
    p = {
        "wq": jax.random.normal(ks[0], (EMB, EMB), jnp.float32) * s,
        "wk": jax.random.normal(ks[1], (EMB, EMB), jnp.float32) * s,
        "wv": jax.random.normal(ks[2], (EMB, EMB), jnp.float32) * s,
        "wo": jax.random.normal(ks[3], (EMB, EMB), jnp.float32) * s,
        "bo": jax.random.normal(ks[4], (1, EMB), jnp.float32) * s,
        "ln1_s": jnp.ones((1, EMB), jnp.float32),
        "ln1_b": jnp.zeros((1, EMB), jnp.float32),
        "ln2_s": jnp.ones((1, EMB), jnp.float32),
        "ln2_b": jnp.zeros((1, EMB), jnp.float32),
        "w1": jax.random.normal(ks[5], (EMB, HIDDEN), jnp.float32) * s,
        "b1": jax.random.normal(ks[6], (1, HIDDEN), jnp.float32) * s,
        "w2": jax.random.normal(ks[7], (HIDDEN, EMB), jnp.float32) * s,
        "b2": jax.random.normal(ks[8], (1, EMB), jnp.float32) * s,
    }
    return p, ks[9]


if __name__ == "__main__":
    key = jax.random.PRNGKey(0)
    params, xkey = init_params(key)
    x = jax.random.normal(xkey, (BATCH, SEQ, EMB), jnp.float32)

    out = transformer_block(x, params)
    out = jax.block_until_ready(out)

    ref = transformer_block_ref(x, params)
    assert out.shape == (BATCH, SEQ, EMB)
    max_err = float(jnp.max(jnp.abs(out - ref)))
    # tolerance slightly loosened vs exact math because the softmax denominator
    # uses the EUP approximate reciprocal (pl.reciprocal(approx=True)).
    assert jnp.allclose(out, ref, atol=2e-3, rtol=2e-3), max_err

    print("KERNEL_OK")
</pallas_src>

<mosaic_0001>
module attributes {stable_mosaic.version = 11 : i64} {
  func.func @transformer_block_kernel(%arg0: memref<16x32xf32, #tpu.memory_space<vmem>>, %arg1: memref<32x96xf32, #tpu.memory_space<vmem>>, %arg2: memref<32x32xf32, #tpu.memory_space<vmem>>, %arg3: memref<1x32xf32, #tpu.memory_space<vmem>>, %arg4: memref<1x32xf32, #tpu.memory_space<vmem>>, %arg5: memref<1x32xf32, #tpu.memory_space<vmem>>, %arg6: memref<1x32xf32, #tpu.memory_space<vmem>>, %arg7: memref<1x32xf32, #tpu.memory_space<vmem>>, %arg8: memref<32x128xf32, #tpu.memory_space<vmem>>, %arg9: memref<1x128xf32, #tpu.memory_space<vmem>>, %arg10: memref<128x32xf32, #tpu.memory_space<vmem>>, %arg11: memref<1x32xf32, #tpu.memory_space<vmem>>, %arg12: memref<16x32xf32, #tpu.memory_space<vmem>>) attributes {dimension_semantics = [], scalar_prefetch = 0 : i64, scratch_operands = 0 : i64, tpu.core_type = #tpu.core_type<tc>} {
    %c0 = arith.constant 0 : index
    %c0_0 = arith.constant 0 : index
    %0 = vector.load %arg0[%c0, %c0_0] : memref<16x32xf32, #tpu.memory_space<vmem>>, vector<16x32xf32>
    %c0_1 = arith.constant 0 : index
    %c0_2 = arith.constant 0 : index
    %1 = vector.load %arg4[%c0_1, %c0_2] : memref<1x32xf32, #tpu.memory_space<vmem>>, vector<1x32xf32>
    %c0_3 = arith.constant 0 : index
    %c0_4 = arith.constant 0 : index
    %2 = vector.load %arg5[%c0_3, %c0_4] : memref<1x32xf32, #tpu.memory_space<vmem>>, vector<1x32xf32>
    %cst = arith.constant dense<0.000000e+00> : vector<16xf32>
    %3 = vector.multi_reduction <add>, %0, %cst [1] : vector<16x32xf32> to vector<16xf32>
    %4 = vector.shape_cast %3 : vector<16xf32> to vector<16x1xf32>
    %cst_5 = arith.constant 3.200000e+01 : f32
    %5 = vector.broadcast %cst_5 : f32 to vector<16x1xf32>
    %6 = arith.divf %4, %5 : vector<16x1xf32>
    %7 = vector.broadcast %6 : vector<16x1xf32> to vector<16x32xf32>
    %8 = arith.subf %0, %7 : vector<16x32xf32>
    %9 = arith.mulf %8, %8 : vector<16x32xf32>
    %cst_6 = arith.constant dense<0.000000e+00> : vector<16xf32>
    %10 = vector.multi_reduction <add>, %9, %cst_6 [1] : vector<16x32xf32> to vector<16xf32>
    %11 = vector.shape_cast %10 : vector<16xf32> to vector<16x1xf32>
    %cst_7 = arith.constant 3.200000e+01 : f32
    %12 = vector.broadcast %cst_7 : f32 to vector<16x1xf32>
    %13 = arith.divf %11, %12 : vector<16x1xf32>
    %14 = vector.broadcast %6 : vector<16x1xf32> to vector<16x32xf32>
    %15 = arith.subf %0, %14 : vector<16x32xf32>
    %cst_8 = arith.constant 9.99999974E-6 : f32
    %16 = vector.broadcast %cst_8 : f32 to vector<16x1xf32>
    %17 = arith.addf %13, %16 : vector<16x1xf32>
    %18 = math.rsqrt %17 : vector<16x1xf32>
    %19 = vector.broadcast %18 : vector<16x1xf32> to vector<16x32xf32>
    %20 = arith.mulf %15, %19 : vector<16x32xf32>
    %21 = vector.broadcast %1 : vector<1x32xf32> to vector<16x32xf32>
    %22 = arith.mulf %21, %20 : vector<16x32xf32>
    %23 = vector.broadcast %2 : vector<1x32xf32> to vector<16x32xf32>
    %24 = arith.addf %22, %23 : vector<16x32xf32>
    %c0_9 = arith.constant 0 : index
    %c0_10 = arith.constant 0 : index
    %25 = vector.load %arg1[%c0_9, %c0_10] : memref<32x96xf32, #tpu.memory_space<vmem>>, vector<32x96xf32>
    %cst_11 = arith.constant dense<0.000000e+00> : vector<16x96xf32>
    %26 = tpu.matmul %24, %25, %cst_11 {dimension_numbers = #tpu.dot_dimension_numbers<[1], [0], [0], [1], [0, 0, 1, 1], [], []>} : vector<16x32xf32>, vector<32x96xf32>, vector<16x96xf32> -> vector<16x96xf32>
    %27 = vector.extract_strided_slice %26 {offsets = [0, 0], sizes = [16, 32], strides = [1, 1]} : vector<16x96xf32> to vector<16x32xf32>
    %cst_12 = arith.constant 0.353553385 : f32
    %28 = vector.broadcast %cst_12 : f32 to vector<16x32xf32>
    %29 = arith.mulf %27, %28 : vector<16x32xf32>
    %30 = vector.extract_strided_slice %26 {offsets = [0, 32], sizes = [16, 32], strides = [1, 1]} : vector<16x96xf32> to vector<16x32xf32>
    %31 = vector.extract_strided_slice %26 {offsets = [0, 64], sizes = [16, 32], strides = [1, 1]} : vector<16x96xf32> to vector<16x32xf32>
    %32 = vector.extract_strided_slice %29 {offsets = [0, 0], sizes = [16, 8], strides = [1, 1]} : vector<16x32xf32> to vector<16x8xf32>
    %33 = vector.extract_strided_slice %29 {offsets = [0, 8], sizes = [16, 8], strides = [1, 1]} : vector<16x32xf32> to vector<16x8xf32>
    %34 = vector.extract_strided_slice %29 {offsets = [0, 16], sizes = [16, 8], strides = [1, 1]} : vector<16x32xf32> to vector<16x8xf32>
    %35 = vector.extract_strided_slice %29 {offsets = [0, 24], sizes = [16, 8], strides = [1, 1]} : vector<16x32xf32> to vector<16x8xf32>
    %36 = vector.shape_cast %32 : vector<16x8xf32> to vector<1x16x8xf32>
    %37 = vector.shape_cast %33 : vector<16x8xf32> to vector<1x16x8xf32>
    %38 = vector.shape_cast %34 : vector<16x8xf32> to vector<1x16x8xf32>
    %39 = vector.shape_cast %35 : vector<16x8xf32> to vector<1x16x8xf32>
    %40 = tpu.concatenate %36, %37, %38, %39 in 0 : vector<1x16x8xf32>, vector<1x16x8xf32>, vector<1x16x8xf32>, vector<1x16x8xf32> -> vector<4x16x8xf32>
    %41 = vector.extract_strided_slice %30 {offsets = [0, 0], sizes = [16, 8], strides = [1, 1]} : vector<16x32xf32> to vector<16x8xf32>
    %42 = vector.extract_strided_slice %30 {offsets = [0, 8], sizes = [16, 8], strides = [1, 1]} : vector<16x32xf32> to vector<16x8xf32>
    %43 = vector.extract_strided_slice %30 {offsets = [0, 16], sizes = [16, 8], strides = [1, 1]} : vector<16x32xf32> to vector<16x8xf32>
    %44 = vector.extract_strided_slice %30 {offsets = [0, 24], sizes = [16, 8], strides = [1, 1]} : vector<16x32xf32> to vector<16x8xf32>
    %45 = vector.shape_cast %41 : vector<16x8xf32> to vector<1x16x8xf32>
    %46 = vector.shape_cast %42 : vector<16x8xf32> to vector<1x16x8xf32>
    %47 = vector.shape_cast %43 : vector<16x8xf32> to vector<1x16x8xf32>
    %48 = vector.shape_cast %44 : vector<16x8xf32> to vector<1x16x8xf32>
    %49 = tpu.concatenate %45, %46, %47, %48 in 0 : vector<1x16x8xf32>, vector<1x16x8xf32>, vector<1x16x8xf32>, vector<1x16x8xf32> -> vector<4x16x8xf32>
    %50 = vector.extract_strided_slice %31 {offsets = [0, 0], sizes = [16, 8], strides = [1, 1]} : vector<16x32xf32> to vector<16x8xf32>
    %51 = vector.extract_strided_slice %31 {offsets = [0, 8], sizes = [16, 8], strides = [1, 1]} : vector<16x32xf32> to vector<16x8xf32>
    %52 = vector.extract_strided_slice %31 {offsets = [0, 16], sizes = [16, 8], strides = [1, 1]} : vector<16x32xf32> to vector<16x8xf32>
    %53 = vector.extract_strided_slice %31 {offsets = [0, 24], sizes = [16, 8], strides = [1, 1]} : vector<16x32xf32> to vector<16x8xf32>
    %54 = vector.shape_cast %50 : vector<16x8xf32> to vector<1x16x8xf32>
    %55 = vector.shape_cast %51 : vector<16x8xf32> to vector<1x16x8xf32>
    %56 = vector.shape_cast %52 : vector<16x8xf32> to vector<1x16x8xf32>
    %57 = vector.shape_cast %53 : vector<16x8xf32> to vector<1x16x8xf32>
    %58 = tpu.concatenate %54, %55, %56, %57 in 0 : vector<1x16x8xf32>, vector<1x16x8xf32>, vector<1x16x8xf32>, vector<1x16x8xf32> -> vector<4x16x8xf32>
    %59 = tpu.iota {dimensions = array<i32: 0>} : vector<16x16xi32>
    %60 = tpu.iota {dimensions = array<i32: 1>} : vector<16x16xi32>
    %false = arith.constant false
    %61 = vector.broadcast %false : i1 to vector<16x16xi1>
    %c0_i32 = arith.constant 0 : i32
    %62 = vector.broadcast %c0_i32 : i32 to vector<16x16xi32>
    %63 = arith.cmpi sge, %59, %62 : vector<16x16xi32>
    %c8_i32 = arith.constant 8 : i32
    %64 = vector.broadcast %c8_i32 : i32 to vector<16x16xi32>
    %65 = arith.cmpi slt, %59, %64 : vector<16x16xi32>
    %66 = arith.andi %63, %65 : vector<16x16xi1>
    %c0_i32_13 = arith.constant 0 : i32
    %67 = vector.broadcast %c0_i32_13 : i32 to vector<16x16xi32>
    %68 = arith.cmpi sge, %60, %67 : vector<16x16xi32>
    %c8_i32_14 = arith.constant 8 : i32
    %69 = vector.broadcast %c8_i32_14 : i32 to vector<16x16xi32>
    %70 = arith.cmpi slt, %60, %69 : vector<16x16xi32>
    %71 = arith.andi %68, %70 : vector<16x16xi1>
    %72 = arith.andi %66, %71 : vector<16x16xi1>
    %73 = arith.ori %61, %72 : vector<16x16xi1>
    %c8_i32_15 = arith.constant 8 : i32
    %74 = vector.broadcast %c8_i32_15 : i32 to vector<16x16xi32>
    %75 = arith.cmpi sge, %59, %74 : vector<16x16xi32>
    %c16_i32 = arith.constant 16 : i32
    %76 = vector.broadcast %c16_i32 : i32 to vector<16x16xi32>
    %77 = arith.cmpi slt, %59, %76 : vector<16x16xi32>
    %78 = arith.andi %75, %77 : vector<16x16xi1>
    %c8_i32_16 = arith.constant 8 : i32
    %79 = vector.broadcast %c8_i32_16 : i32 to vector<16x16xi32>
    %80 = arith.cmpi sge, %60, %79 : vector<16x16xi32>
    %c16_i32_17 = arith.constant 16 : i32
    %81 = vector.broadcast %c16_i32_17 : i32 to vector<16x16xi32>
    %82 = arith.cmpi slt, %60, %81 : vector<16x16xi32>
    %83 = arith.andi %80, %82 : vector<16x16xi1>
    %84 = arith.andi %78, %83 : vector<16x16xi1>
    %85 = arith.ori %73, %84 : vector<16x16xi1>
    %86 = arith.cmpi sle, %60, %59 : vector<16x16xi32>
    %87 = arith.andi %85, %86 : vector<16x16xi1>
    %cst_18 = arith.constant dense<true> : vector<16x16xi1>
    %88 = arith.xori %87, %cst_18 : vector<16x16xi1>
    %89 = vector.shape_cast %88 : vector<16x16xi1> to vector<1x16x16xi1>
    "tpu.trace_start"() <{level = 10 : i32, message = "hqd,hkd->hqk"}> : () -> ()
    %cst_19 = arith.constant dense<0.000000e+00> : vector<4x16x16xf32>
    %90 = tpu.matmul %40, %49, %cst_19 {dimension_numbers = #tpu.dot_dimension_numbers<[2], [2], [1], [1], [0, 0, 0, 1, 1, 1], [0], [0]>} : vector<4x16x8xf32>, vector<4x16x8xf32>, vector<4x16x16xf32> -> vector<4x16x16xf32>
    %cst_20 = arith.constant 0xFF800000 : f32
    "tpu.trace_stop"() : () -> ()
    %91 = vector.shape_cast %89 : vector<1x16x16xi1> to vector<1x16x16xi1>
    %92 = vector.broadcast %91 : vector<1x16x16xi1> to vector<4x16x16xi1>
    %93 = vector.broadcast %cst_20 : f32 to vector<4x16x16xf32>
    %94 = arith.select %92, %93, %90 : vector<4x16x16xi1>, vector<4x16x16xf32>
    %cst_21 = arith.constant dense<0xFF800000> : vector<4x16xf32>
    %95 = vector.multi_reduction <maximumf>, %94, %cst_21 [2] : vector<4x16x16xf32> to vector<4x16xf32>
    %96 = vector.shape_cast %95 : vector<4x16xf32> to vector<4x16x1xf32>
    %97 = vector.broadcast %96 : vector<4x16x1xf32> to vector<4x16x16xf32>
    %98 = arith.subf %94, %97 : vector<4x16x16xf32>
    %99 = math.exp %98 : vector<4x16x16xf32>
    %cst_22 = arith.constant dense<0.000000e+00> : vector<4x16xf32>
    %100 = vector.multi_reduction <add>, %99, %cst_22 [2] : vector<4x16x16xf32> to vector<4x16xf32>
    %101 = vector.shape_cast %100 : vector<4x16xf32> to vector<4x16x1xf32>
    %102 = tpu.reciprocal %101 {approx = true} : vector<4x16x1xf32> -> vector<4x16x1xf32>
    %103 = vector.broadcast %102 : vector<4x16x1xf32> to vector<4x16x16xf32>
    %104 = arith.mulf %99, %103 : vector<4x16x16xf32>
    "tpu.trace_start"() <{level = 10 : i32, message = "hqk,hkd->hqd"}> : () -> ()
    %cst_23 = arith.constant dense<0.000000e+00> : vector<4x16x8xf32>
    %105 = tpu.matmul %104, %58, %cst_23 {dimension_numbers = #tpu.dot_dimension_numbers<[2], [1], [1], [2], [0, 0, 0, 1, 1, 2], [0], [0]>} : vector<4x16x16xf32>, vector<4x16x8xf32>, vector<4x16x8xf32> -> vector<4x16x8xf32>
    "tpu.trace_stop"() : () -> ()
    %106 = vector.extract_strided_slice %105 {offsets = [0, 0, 0], sizes = [1, 16, 8], strides = [1, 1, 1]} : vector<4x16x8xf32> to vector<1x16x8xf32>
    %107 = vector.shape_cast %106 : vector<1x16x8xf32> to vector<16x8xf32>
    %108 = vector.extract_strided_slice %105 {offsets = [1, 0, 0], sizes = [1, 16, 8], strides = [1, 1, 1]} : vector<4x16x8xf32> to vector<1x16x8xf32>
    %109 = vector.shape_cast %108 : vector<1x16x8xf32> to vector<16x8xf32>
    %110 = vector.extract_strided_slice %105 {offsets = [2, 0, 0], sizes = [1, 16, 8], strides = [1, 1, 1]} : vector<4x16x8xf32> to vector<1x16x8xf32>
    %111 = vector.shape_cast %110 : vector<1x16x8xf32> to vector<16x8xf32>
    %112 = vector.extract_strided_slice %105 {offsets = [3, 0, 0], sizes = [1, 16, 8], strides = [1, 1, 1]} : vector<4x16x8xf32> to vector<1x16x8xf32>
    %113 = vector.shape_cast %112 : vector<1x16x8xf32> to vector<16x8xf32>
    %114 = tpu.concatenate %107, %109, %111, %113 in 1 : vector<16x8xf32>, vector<16x8xf32>, vector<16x8xf32>, vector<16x8xf32> -> vector<16x32xf32>
    %c0_24 = arith.constant 0 : index
    %c0_25 = arith.constant 0 : index
    %115 = vector.load %arg2[%c0_24, %c0_25] : memref<32x32xf32, #tpu.memory_space<vmem>>, vector<32x32xf32>
    %cst_26 = arith.constant dense<0.000000e+00> : vector<16x32xf32>
    %116 = tpu.matmul %114, %115, %cst_26 {dimension_numbers = #tpu.dot_dimension_numbers<[1], [0], [0], [1], [0, 0, 1, 1], [], []>} : vector<16x32xf32>, vector<32x32xf32>, vector<16x32xf32> -> vector<16x32xf32>
    %c0_27 = arith.constant 0 : index
    %c0_28 = arith.constant 0 : index
    %117 = vector.load %arg3[%c0_27, %c0_28] : memref<1x32xf32, #tpu.memory_space<vmem>>, vector<1x32xf32>
    %118 = vector.broadcast %117 : vector<1x32xf32> to vector<16x32xf32>
    %119 = arith.addf %116, %118 : vector<16x32xf32>
    %120 = arith.addf %119, %0 : vector<16x32xf32>
    %c0_29 = arith.constant 0 : index
    %c0_30 = arith.constant 0 : index
    %121 = vector.load %arg6[%c0_29, %c0_30] : memref<1x32xf32, #tpu.memory_space<vmem>>, vector<1x32xf32>
    %c0_31 = arith.constant 0 : index
    %c0_32 = arith.constant 0 : index
    %122 = vector.load %arg7[%c0_31, %c0_32] : memref<1x32xf32, #tpu.memory_space<vmem>>, vector<1x32xf32>
    %cst_33 = arith.constant dense<0.000000e+00> : vector<16xf32>
    %123 = vector.multi_reduction <add>, %120, %cst_33 [1] : vector<16x32xf32> to vector<16xf32>
    %124 = vector.shape_cast %123 : vector<16xf32> to vector<16x1xf32>
    %cst_34 = arith.constant 3.200000e+01 : f32
    %125 = vector.broadcast %cst_34 : f32 to vector<16x1xf32>
    %126 = arith.divf %124, %125 : vector<16x1xf32>
    %127 = vector.broadcast %126 : vector<16x1xf32> to vector<16x32xf32>
    %128 = arith.subf %120, %127 : vector<16x32xf32>
    %129 = arith.mulf %128, %128 : vector<16x32xf32>
    %cst_35 = arith.constant dense<0.000000e+00> : vector<16xf32>
    %130 = vector.multi_reduction <add>, %129, %cst_35 [1] : vector<16x32xf32> to vector<16xf32>
    %131 = vector.shape_cast %130 : vector<16xf32> to vector<16x1xf32>
    %cst_36 = arith.constant 3.200000e+01 : f32
    %132 = vector.broadcast %cst_36 : f32 to vector<16x1xf32>
    %133 = arith.divf %131, %132 : vector<16x1xf32>
    %134 = vector.broadcast %126 : vector<16x1xf32> to vector<16x32xf32>
    %135 = arith.subf %120, %134 : vector<16x32xf32>
    %cst_37 = arith.constant 9.99999974E-6 : f32
    %136 = vector.broadcast %cst_37 : f32 to vector<16x1xf32>
    %137 = arith.addf %133, %136 : vector<16x1xf32>
    %138 = math.rsqrt %137 : vector<16x1xf32>
    %139 = vector.broadcast %138 : vector<16x1xf32> to vector<16x32xf32>
    %140 = arith.mulf %135, %139 : vector<16x32xf32>
    %141 = vector.broadcast %121 : vector<1x32xf32> to vector<16x32xf32>
    %142 = arith.mulf %141, %140 : vector<16x32xf32>
    %143 = vector.broadcast %122 : vector<1x32xf32> to vector<16x32xf32>
    %144 = arith.addf %142, %143 : vector<16x32xf32>
    %c0_38 = arith.constant 0 : index
    %c0_39 = arith.constant 0 : index
    %145 = vector.load %arg8[%c0_38, %c0_39] : memref<32x128xf32, #tpu.memory_space<vmem>>, vector<32x128xf32>
    %cst_40 = arith.constant dense<0.000000e+00> : vector<16x128xf32>
    %146 = tpu.matmul %144, %145, %cst_40 {dimension_numbers = #tpu.dot_dimension_numbers<[1], [0], [0], [1], [0, 0, 1, 1], [], []>} : vector<16x32xf32>, vector<32x128xf32>, vector<16x128xf32> -> vector<16x128xf32>
    %c0_41 = arith.constant 0 : index
    %c0_42 = arith.constant 0 : index
    %147 = vector.load %arg9[%c0_41, %c0_42] : memref<1x128xf32, #tpu.memory_space<vmem>>, vector<1x128xf32>
    %148 = vector.broadcast %147 : vector<1x128xf32> to vector<16x128xf32>
    %149 = arith.addf %146, %148 : vector<16x128xf32>
    %cst_43 = arith.constant 5.000000e-01 : f32
    %150 = vector.broadcast %cst_43 : f32 to vector<16x128xf32>
    %151 = arith.mulf %150, %149 : vector<16x128xf32>
    %cst_44 = arith.constant 4.471500e-02 : f32
    %152 = vector.broadcast %cst_44 : f32 to vector<16x128xf32>
    %153 = arith.mulf %152, %149 : vector<16x128xf32>
    %154 = arith.mulf %153, %149 : vector<16x128xf32>
    %155 = arith.mulf %154, %149 : vector<16x128xf32>
    %156 = arith.addf %149, %155 : vector<16x128xf32>
    %cst_45 = arith.constant 0.797884583 : f32
    %157 = vector.broadcast %cst_45 : f32 to vector<16x128xf32>
    %158 = arith.mulf %157, %156 : vector<16x128xf32>
    %159 = math.tanh %158 : vector<16x128xf32>
    %cst_46 = arith.constant 1.000000e+00 : f32
    %160 = vector.broadcast %cst_46 : f32 to vector<16x128xf32>
    %161 = arith.addf %160, %159 : vector<16x128xf32>
    %162 = arith.mulf %151, %161 : vector<16x128xf32>
    %c0_47 = arith.constant 0 : index
    %c0_48 = arith.constant 0 : index
    %163 = vector.load %arg10[%c0_47, %c0_48] : memref<128x32xf32, #tpu.memory_space<vmem>>, vector<128x32xf32>
    %cst_49 = arith.constant dense<0.000000e+00> : vector<16x32xf32>
    %164 = tpu.matmul %162, %163, %cst_49 {dimension_numbers = #tpu.dot_dimension_numbers<[1], [0], [0], [1], [0, 0, 1, 1], [], []>} : vector<16x128xf32>, vector<128x32xf32>, vector<16x32xf32> -> vector<16x32xf32>
    %c0_50 = arith.constant 0 : index
    %c0_51 = arith.constant 0 : index
    %165 = vector.load %arg11[%c0_50, %c0_51] : memref<1x32xf32, #tpu.memory_space<vmem>>, vector<1x32xf32>
    %166 = vector.broadcast %165 : vector<1x32xf32> to vector<16x32xf32>
    %167 = arith.addf %164, %166 : vector<16x32xf32>
    %168 = arith.addf %167, %0 : vector<16x32xf32>
    %c0_52 = arith.constant 0 : index
    %c0_53 = arith.constant 0 : index
    %169 = vector.load %arg12[%c0_52, %c0_53] : memref<16x32xf32, #tpu.memory_space<vmem>>, vector<16x32xf32>
    tpu.vector_store %arg12[%c0_52, %c0_53], %168 {strides = array<i32>} : memref<16x32xf32, #tpu.memory_space<vmem>>, vector<16x32xf32>,
    return
  }
}

</mosaic_0001>

<bundles_post_ra>
// kernel: tpu_custom_call.1
= control target key start
LH: loop header
LB: loop body
LE: loop exit
PB: predicated region body
PF: predicated region fallthrough
CT: control target
= control target key end

     0   :  { %vm46_vm0 = vcmask 261120   ;;  %s2106_s0 = inlined_call_operand.vmem [shape: f32[16,32], index: 0, kind: input, shape index: {}]   ;;  %s2107_s1 = inlined_call_operand.vmem [shape: f32[32,96], index: 1, kind: input, shape index: {}]   ;;  %s2108_s2 = inlined_call_operand.vmem [shape: f32[32,32], index: 2, kind: input, shape index: {}]   ;;  %s2109_s3 = inlined_call_operand.vmem [shape: f32[1,32], index: 3, kind: input, shape index: {}]   ;;  %s2110_s4 = inlined_call_operand.vmem [shape: f32[1,32], index: 4, kind: input, shape index: {}]   ;;  %s2111_s5 = inlined_call_operand.vmem [shape: f32[1,32], index: 5, kind: input, shape index: {}]   ;;  %s2112_s6 = inlined_call_operand.vmem [shape: f32[1,32], index: 6, kind: input, shape index: {}]   ;;  %s2113_s7 = inlined_call_operand.vmem [shape: f32[1,32], index: 7, kind: input, shape index: {}]   ;;  %s2114_s8 = inlined_call_operand.vmem [shape: f32[32,128], index: 8, kind: input, shape index: {}]   ;;  %s2115_s9 = inlined_call_operand.vmem [shape: f32[1,128], index: 9, kind: input, shape index: {}]   ;;  %s2116_s10 = inlined_call_operand.vmem [shape: f32[128,32], index: 10, kind: input, shape index: {}]   ;;  %s2117_s11 = inlined_call_operand.vmem [shape: f32[1,32], index: 11, kind: input, shape index: {}]   ;;  %s2118_s12 = inlined_call_operand.hbm [shape: f32[16,32], index: 12, kind: output, shape index: {}]  }
   0x1   :  { %v1820_v0 = vld [vmem:[%s2106_s0] sm:$0xff]  ;;  %v1825_v1 = vld [vmem:[%s2106_s0 + $0x8] sm:$0xff] }
   0x2   :  { %17 = vsyncpa [#allocation3], 0  ;;  %v47_v2 = vsel %vm46_vm0, %v1820_v0, 0.0  ;;  %v50_v3 = vsel %vm46_vm0, %v1825_v1, 0.0  ;;  %v93_v14 = vld [vmem:[%s2107_s1 + $0x18] sm:$0xff]  ;;  %v92_v15 = vld [vmem:[%s2107_s1 + $0x10] sm:$0xff]  ;;  %v205_v58 = vlaneseq }
   0x3   :  { %48 = vadd.xlane.f32.xlu0 %v47_v2  ;;  %1540 = vmatprep.subr.mxu1 %v93_v14  ;;  %v91_v16 = vld [vmem:[%s2107_s1 + $0x8] sm:$0xff]  ;;  %v90_v17 = vld [vmem:[%s2107_s1] sm:$0xff]  ;;  %s1741_s1 = smov 120   ;;  %vm244_vm1 = vcmask 64512   ;;  %s1744_s18 = smov 104   ;;  %vm1745_vm10 = vmmov 1  }
   0x4   :  { %1541 = vmatpush3.msra.mxu1 %v93_v14  ;;  %v1435_v25 = vld [vmem:[%s2110_s4] ss:$0 sm:$0xff]  ;;  %s1742_s4 = smov 112   ;;  %v206_v59 = vshrl.u32 %v205_v58, 7  ;;  %v209_v60 = vand.u32 127, %v205_v58  ;;  %vm601_vm12 = vcmask 130048  }
   0x5   :  { %1542 = vmatprep.subr.mxu1 %v92_v15  ;;  %v1436_v27 = vld [vmem:[%s2111_s5] ss:$0 sm:$0xff]  ;;  %s1743_s5 = smov 96   ;;  %s1746_s19 = smov 64   ;;  %vm1066_vm14 = vcmask 195584  }
   0x6   :  { %1543 = vmatpush3.msra.mxu1 %v92_v15  ;;  %v207_v61 = vadd.s32 8, %v206_v59  ;;  %vm227_vm2 = vcmp.ge.s32.totalorder %v209_v60, 8  ;;  %vm228_vm3 = vcmp.lt.s32.totalorder %v209_v60, 16  ;;  %vm217_vm6 = vcmp.lt.s32.totalorder %v209_v60, 8  ;;  %s1747_s20 = smov 8   ;;  %s1748_s28 = smov 16  }
   0x7   :  { %51 = vadd.xlane.f32.xlu0 %v50_v3  ;;  %1544 = vmatprep.subr.mxu1 %v91_v16  ;;  %vm229_vm4 = vmand %vm227_vm2, %vm228_vm3  ;;  %vm234_vm7 = vcmp.le.s32.totalorder %v209_v60, %v206_v59  ;;  %s1749_s29 = smov 24   ;;  %s1750_s26 = smov [#allocation2]  }
   0x8   :  { %1545 = vmatpush3.msra.mxu1 %v91_v16  ;;  %vm235_vm5 = vcmp.le.s32.totalorder %v209_v60, %v207_v61  ;;  %vm236_vm9 = vmand %vm217_vm6, %vm234_vm7  ;;  %s1424_s27 = sshll.u32 %s1750_s26, 4  ;;  %s1425_s27 = int_to_ptr.vmem [resolvable:$true] %s1424_s27 }
   0x9   :  { %1546 = vmatprep.subr.mxu1 %v90_v17  ;;  %vm237_vm8 = vmand %vm229_vm4, %vm235_vm5  ;;  %p1724_p1 = scmp.lt.s32.totalorder %s1425_s27, %s1425_s27 }
   0xa   :  { %1547 = vmatpush3.msra.mxu1 %v90_v17  ;;  %vm1915_vm11 = vmxor %vm237_vm8, %vm1745_vm10 }
   0xb   :  { %vm1919_vm13 = vmxor %vm236_vm9, %vm1745_vm10 }
  0x8c   :  { %v49_v4 = vpop.xlane.xlu0 %48 }
  0x8d   :  { %v54_v5 = vmul.f32 0.03125, %v49_v4 }
  0x8f   :  { %v56_v6 = vsub.f32 %v1820_v0, %v54_v5 }
  0x90   :  { %v52_v7 = vpop.xlane.xlu0 %51 }
  0x91   :  { %v55_v8 = vmul.f32 0.03125, %v52_v7  ;;  %v58_v9 = vmul.f32 %v56_v6, %v56_v6 }
  0x93   :  { %v57_v10 = vsub.f32 %v1825_v1, %v55_v8  ;;  %v60_v11 = vsel %vm46_vm0, %v58_v9, 0.0 }
  0x94   :  { %61 = vadd.xlane.f32.xlu1 %v60_v11 }
  0x95   :  { %v59_v12 = vmul.f32 %v57_v10, %v57_v10 }
  0x97   :  { %v63_v13 = vsel %vm46_vm0, %v59_v12, 0.0 }
  0x98   :  { %64 = vadd.xlane.f32.xlu1 %v63_v13 }
 0x11d   :  { %v62_v18 = vpop.xlane.xlu1 %61 }
 0x11e   :  { %v66_v19 = vmul.f32 0.03125, %v62_v18 }
 0x120   :  { %v68_v20 = vadd.f32 1e-05, %v66_v19 }
 0x121   :  { %v65_v21 = vpop.xlane.xlu1 %64 }
 0x122   :  { %1675 = vrsqrt.f32 %v68_v20  ;;  %v67_v22 = vmul.f32 0.03125, %v65_v21 }
 0x124   :  { %v69_v23 = vadd.f32 1e-05, %v67_v22 }
 0x126   :  { %1677 = vrsqrt.f32 %v69_v23 }
 0x12f   :  { %v1676_v24 = vpop.eup %1675 }
 0x130   :  { %v72_v26 = vmul.f32 %v1676_v24, %v56_v6 }
 0x132   :  { %v80_v28 = vmul.f32 %v1435_v25, %v72_v26 }
 0x133   :  { %v1678_v29 = vpop.eup %1677 }
 0x134   :  { %v73_v30 = vmul.f32 %v1678_v29, %v57_v10  ;;  %v88_v31 = vadd.f32 %v1436_v27, %v80_v28 }
 0x136   :  { %v81_v32 = vmul.f32 %v1435_v25, %v73_v30  ;;  %1548 = vmatprep.mubr.msk.f32.mxu1 %vm46_vm0, %v88_v31 }
 0x138   :  { %v89_v33 = vadd.f32 %v1436_v27, %v81_v32 }
 0x13a   :  { %1549 = vmatmul.mubr.msk.f32.vlgmr.msra.gmra.mxu1 %vm46_vm0, %v89_v33 }
 0x1fa   :  { %v1855_v34 = vpop.f32.mrf.mxu1 }
 0x1fb   :  { %195 = vrot.lane.b32.xlu0 %v1855_v34, %s1741_s1  ;;  %v176_v39 = vmul.f32 0.35355338, %v1855_v34 }
 0x1fc   :  { %v1858_v35 = vpop.f32.mrf.mxu1 }
 0x1fd   :  { %193 = vrot.lane.b32.xlu1 %v1858_v35, %s1741_s1  ;;  %v175_v36 = vmul.f32 0.35355338, %v1858_v35 }
 0x1ff   :  { %197 = vrot.lane.b32.xlu0 %v1858_v35, %s1742_s4  ;;  %1555 = vmatprep.mubr.msk.f32.mxu1 %vm244_vm1, %v175_v36 }
 0x201   :  { %199 = vrot.lane.b32.xlu1 %v1855_v34, %s1742_s4 }
 0x203   :  { %242 = vrot.lane.b32.xlu0 %v1855_v34, %s1743_s5 }
 0x205   :  { %203 = vrot.lane.b32.xlu1 %v1855_v34, %s1744_s18 }
 0x207   :  { %179 = vrot.lane.b32.xlu0 %v175_v36, %s1741_s1 }
 0x209   :  { %201 = vrot.lane.b32.xlu1 %v1858_v35, %s1744_s18 }
 0x20d   :  { %240 = vrot.lane.b32.xlu1 %v1858_v35, %s1743_s5 }
 0x26d   :  { %v1871_v37 = vpop.permute.xlu0 %195 }
 0x26e   :  { %330 = vrot.lane.b32.xlu0 %v1871_v37, %s1743_s5 }
 0x26f   :  { %v1874_v38 = vpop.permute.xlu1 %193 }
 0x271   :  { %v1877_v40 = vpop.permute.xlu0 %197 }
 0x272   :  { %181 = vrot.lane.b32.xlu0 %v176_v39, %s1741_s1 }
 0x273   :  { %v1879_v41 = vpop.permute.xlu1 %199 }
 0x274   :  { %417 = vrot.lane.b32.xlu1 %v1879_v41, %s1743_s5 }
 0x275   :  { %v243_v42 = vpop.permute.xlu0 %242 }
 0x276   :  { %1551 = vmatprep.subr.msk.mxu1 %vm244_vm1, %v243_v42  ;;  %183 = vrot.lane.b32.xlu0 %v175_v36, %s1742_s4 }
 0x277   :  { %1552 = vmatpush3.xpose.msk.msra.mxu1 %vm244_vm1, %v243_v42  ;;  %v1884_v43 = vpop.permute.xlu1 %203 }
 0x278   :  { %328 = vrot.lane.b32.xlu1 %v1874_v38, %s1743_s5 }
 0x279   :  { %v180_v46 = vpop.permute.xlu0 %179 }
 0x27a   :  { %415 = vrot.lane.b32.xlu0 %v1877_v40, %s1743_s5 }
 0x27b   :  { %v1888_v44 = vpop.permute.xlu1 %201 }
 0x27c   :  { %504 = vrot.lane.b32.xlu1 %v1884_v43, %s1743_s5 }
 0x27e   :  { %187 = vrot.lane.b32.xlu0 %v175_v36, %s1744_s18 }
 0x27f   :  { %v241_v45 = vpop.permute.xlu1 %240 }
 0x280   :  { %185 = vrot.lane.b32.xlu1 %v176_v39, %s1742_s4  ;;  %1553 = vmatprep.subr.msk.mxu1 %vm244_vm1, %v241_v45 }
 0x281   :  { %1554 = vmatpush3.xpose.msk.msra.mxu1 %vm244_vm1, %v241_v45 }
 0x284   :  { %502 = vrot.lane.b32.xlu1 %v1888_v44, %s1743_s5  ;;  %1556 = vmatmul.mubr.msk.f32.vlgmr.msra.gmra.mxu1 %vm244_vm1, %v176_v39 }
 0x285   :  { %1562 = vmatprep.mubr.msk.f32.mxu1 %vm244_vm1, %v180_v46 }
 0x288   :  { %189 = vrot.lane.b32.xlu1 %v176_v39, %s1744_s18 }
 0x2e0   :  { %v331_v47 = vpop.permute.xlu0 %330 }
 0x2e1   :  { %1558 = vmatprep.subr.msk.mxu1 %vm244_vm1, %v331_v47 }
 0x2e2   :  { %1559 = vmatpush3.xpose.msk.msra.mxu1 %vm244_vm1, %v331_v47 }
 0x2e4   :  { %v182_v48 = vpop.permute.xlu0 %181 }
 0x2e6   :  { %v418_v49 = vpop.permute.xlu1 %417 }
 0x2e8   :  { %v184_v50 = vpop.permute.xlu0 %183 }
 0x2ea   :  { %v329_v51 = vpop.permute.xlu1 %328 }
 0x2eb   :  { %1560 = vmatprep.subr.msk.mxu1 %vm244_vm1, %v329_v51 }
 0x2ec   :  { %v416_v52 = vpop.permute.xlu0 %415  ;;  %1561 = vmatpush3.xpose.msk.msra.mxu1 %vm244_vm1, %v329_v51 }
 0x2ed   :  { %1565 = vmatprep.subr.msk.mxu1 %vm244_vm1, %v418_v49 }
 0x2ee   :  { %v505_v53 = vpop.permute.xlu1 %504 }
 0x2ef   :  { %1563 = vmatmul.mubr.msk.f32.vlgmr.msra.gmra.mxu1 %vm244_vm1, %v182_v48  ;;  %1572 = vmatprep.subr.msk.mxu0 %vm244_vm1, %v505_v53 }
 0x2f0   :  { %1573 = vmatpush3.xpose.msk.msra.mxu0 %vm244_vm1, %v505_v53  ;;  %v188_v54 = vpop.permute.xlu0 %187  ;;  %1566 = vmatpush3.xpose.msk.msra.mxu1 %vm244_vm1, %v418_v49 }
 0x2f1   :  { %1569 = vmatprep.mubr.msk.f32.mxu1 %vm244_vm1, %v184_v50  ;;  %1567 = vmatprep.subr.msk.mxu1 %vm244_vm1, %v416_v52 }
 0x2f2   :  { %1576 = vmatprep.mubr.msk.f32.mxu0 %vm244_vm1, %v188_v54  ;;  %v186_v55 = vpop.permute.xlu1 %185 }
 0x2f4   :  { %1568 = vmatpush3.xpose.msk.msra.mxu1 %vm244_vm1, %v416_v52 }
 0x2f6   :  { %v503_v56 = vpop.permute.xlu1 %502 }
 0x2f7   :  { %1570 = vmatmul.mubr.msk.f32.vlgmr.msra.gmra.mxu1 %vm244_vm1, %v186_v55  ;;  %1574 = vmatprep.subr.msk.mxu0 %vm244_vm1, %v503_v56 }
 0x2f8   :  { %1575 = vmatpush3.xpose.msk.msra.mxu0 %vm244_vm1, %v503_v56 }
 0x2fa   :  { %v190_v57 = vpop.permute.xlu1 %189 }
 0x2fb   :  { %1577 = vmatmul.mubr.msk.f32.vlgmr.msra.gmra.mxu0 %vm244_vm1, %v190_v57 }
 0x344   :  { %v1557_v63 = vpop.f32.mrf.mxu1 }
 0x345   :  { %v594_v3 = vsel %vm1915_vm11, -inf, %v1557_v63 }
 0x346   :  { %v319_v4 = vpop.f32.mrf.mxu1  ;;  %v605_v5 = vsel %vm601_vm12, %v594_v3, -inf }
 0x347   :  { %v593_v6 = vsel %vm1919_vm13, -inf, %v319_v4  ;;  %606 = vmax.xlane.f32.xlu1 %v605_v5 }
 0x348   :  { %v602_v7 = vsel %vm601_vm12, %v593_v6, -inf }
 0x349   :  { %603 = vmax.xlane.f32.xlu0 %v602_v7 }
 0x3af   :  { %v1564_v8 = vpop.f32.mrf.mxu1 }
 0x3b0   :  { %v596_v9 = vsel %vm1915_vm11, -inf, %v1564_v8 }
 0x3b1   :  { %v406_v10 = vpop.f32.mrf.mxu1  ;;  %v611_v11 = vsel %vm601_vm12, %v596_v9, -inf }
 0x3b2   :  { %v595_v12 = vsel %vm1919_vm13, -inf, %v406_v10  ;;  %612 = vmax.xlane.f32.xlu0 %v611_v11 }
 0x3b3   :  { %v608_v13 = vsel %vm601_vm12, %v595_v12, -inf }
 0x3b6   :  { %609 = vmax.xlane.f32.xlu0 %v608_v13 }
 0x3b7   :  { %v1571_v14 = vpop.f32.mrf.mxu1 }
 0x3b8   :  { %v598_v15 = vsel %vm1915_vm11, -inf, %v1571_v14 }
 0x3b9   :  { %v493_v16 = vpop.f32.mrf.mxu1  ;;  %v617_v17 = vsel %vm601_vm12, %v598_v15, -inf }
 0x3ba   :  { %v597_v18 = vsel %vm1919_vm13, -inf, %v493_v16  ;;  %618 = vmax.xlane.f32.xlu1 %v617_v17 }
 0x3bb   :  { %v1578_v19 = vpop.f32.mrf.mxu0  ;;  %v614_v20 = vsel %vm601_vm12, %v597_v18, -inf }
 0x3bc   :  { %v600_v21 = vsel %vm1915_vm11, -inf, %v1578_v19  ;;  %615 = vmax.xlane.f32.xlu0 %v614_v20 }
 0x3bd   :  { %v580_v22 = vpop.f32.mrf.mxu0  ;;  %v623_v23 = vsel %vm601_vm12, %v600_v21, -inf }
 0x3be   :  { %v599_v24 = vsel %vm1919_vm13, -inf, %v580_v22  ;;  %624 = vmax.xlane.f32.xlu1 %v623_v23 }
 0x3bf   :  { %v620_v25 = vsel %vm601_vm12, %v599_v24, -inf }
 0x3c0   :  { %621 = vmax.xlane.f32.xlu0 %v620_v25 }
 0x3cf   :  { %690 = vrot.lane.b32.xlu1 %v1858_v35, %s1746_s19 }
 0x3d0   :  { %v607_v28 = vpop.xlane.xlu1 %606 }
 0x3d1   :  { %v627_v30 = vsub.f32 %v594_v3, %v607_v28 }
 0x3d2   :  { %v604_v26 = vpop.xlane.xlu0 %603 }
 0x3d3   :  { %779 = vrot.lane.b32.xlu1 %v1871_v37, %s1746_s19  ;;  %v626_v27 = vsub.f32 %v593_v6, %v604_v26  ;;  %v636_v31 = vmul.f32 1.442695, %v627_v30 }
 0x3d5   :  { %v634_v29 = vmul.f32 1.442695, %v626_v27 }
 0x3d6   :  { %692 = vrot.lane.b32.xlu0 %v1855_v34, %s1746_s19 }
 0x3d7   :  { %777 = vrot.lane.b32.xlu1 %v1874_v38, %s1746_s19  ;;  %1679 = vpow2.f32 %v634_v29 }
 0x3d8   :  { %1681 = vpow2.f32 %v636_v31 }
 0x3da   :  { %866 = vrot.lane.b32.xlu0 %v1879_v41, %s1746_s19 }
 0x3db   :  { %953 = vrot.lane.b32.xlu1 %v1884_v43, %s1746_s19 }
 0x3e4   :  { %v1959_v32 = vpop.eup %1679 }
 0x3e5   :  { %v650_v33 = vsel %vm601_vm12, %v1959_v32, 0.0  ;;  %v1963_v34 = vpop.eup %1681 }
 0x3e6   :  { %v653_v35 = vsel %vm601_vm12, %v1963_v34, 0.0 }
 0x3f9   :  { %651 = vadd.xlane.f32.xlu0 %v650_v33 }
 0x3ff   :  { %654 = vadd.xlane.f32.xlu1 %v653_v35 }
 0x43b   :  { %v613_v36 = vpop.xlane.xlu0 %612 }
 0x43c   :  { %v629_v37 = vsub.f32 %v596_v9, %v613_v36 }
 0x43e   :  { %v640_v38 = vmul.f32 1.442695, %v629_v37 }
 0x43f   :  { %v610_v39 = vpop.xlane.xlu0 %609 }
 0x440   :  { %1683 = vpow2.f32 %v640_v38  ;;  %v628_v41 = vsub.f32 %v595_v12, %v610_v39 }
 0x442   :  { %v638_v42 = vmul.f32 1.442695, %v628_v41  ;;  %v1072_v41 = vld [vmem:[%s2108_s2 + $0x18] sm:$0xff] }
 0x443   :  { %v619_v43 = vpop.xlane.xlu1 %618 }
 0x444   :  { %1685 = vpow2.f32 %v638_v42  ;;  %v631_v45 = vsub.f32 %v598_v15, %v619_v43  ;;  %v1071_v42 = vld [vmem:[%s2108_s2 + $0x10] sm:$0xff]  ;;  %v1070_v43 = vld [vmem:[%s2108_s2 + $0x8] sm:$0xff] }
 0x445   :  { %v616_v46 = vpop.xlane.xlu0 %615 }
 0x446   :  { %v630_v48 = vsub.f32 %v597_v18, %v616_v46  ;;  %v644_v50 = vmul.f32 1.442695, %v631_v45  ;;  %v1069_v45 = vld [vmem:[%s2108_s2] sm:$0xff] }
 0x447   :  { %v625_v47 = vpop.xlane.xlu1 %624 }
 0x448   :  { %v633_v49 = vsub.f32 %v600_v21, %v625_v47  ;;  %v642_v55 = vmul.f32 1.442695, %v630_v48 }
 0x449   :  { %v622_v51 = vpop.xlane.xlu0 %621 }
 0x44a   :  { %v648_v52 = vmul.f32 1.442695, %v633_v49  ;;  %v632_v53 = vsub.f32 %v599_v24, %v622_v51 }
 0x44b   :  { %v691_v54 = vpop.permute.xlu1 %690 }
 0x44c   :  { %1687 = vpow2.f32 %v648_v52  ;;  %v646_v56 = vmul.f32 1.442695, %v632_v53 }
 0x44d   :  { %v1967_v57 = vpop.eup %1683  ;;  %1689 = vpow2.f32 %v644_v50  ;;  %v693_v58 = vpop.permute.xlu0 %692 }
 0x44e   :  { %1691 = vpow2.f32 %v646_v56  ;;  %1579 = vmatprep.subr.mxu1 %v693_v58  ;;  %v659_v59 = vsel %vm601_vm12, %v1967_v57, 0.0 }
 0x44f   :  { %660 = vadd.xlane.f32.xlu1 %v659_v59  ;;  %1580 = vmatpush3.msra.mxu1 %v693_v58  ;;  %1693 = vpow2.f32 %v642_v55  ;;  %v780_v61 = vpop.permute.xlu1 %779 }
 0x450   :  { %1581 = vmatprep.subr.mxu1 %v691_v54 }
 0x451   :  { %v1686_v60 = vpop.eup %1685  ;;  %1582 = vmatpush3.msra.mxu1 %v691_v54  ;;  %v867_v62 = vpop.permute.xlu0 %866 }
 0x452   :  { %1586 = vmatprep.subr.mxu1 %v780_v61  ;;  %1593 = vmatprep.subr.mxu0 %v867_v62  ;;  %v656_v63 = vsel %vm601_vm12, %v1686_v60, 0.0 }
 0x453   :  { %657 = vadd.xlane.f32.xlu0 %v656_v63  ;;  %1594 = vmatpush3.msra.mxu0 %v867_v62  ;;  %v778_v10 = vpop.permute.xlu1 %777  ;;  %v1463_v62 = vld [vmem:[%s2109_s3] ss:$0 sm:$0xff] }
 0x457   :  { %v954_v12 = vpop.permute.xlu1 %953 }
 0x459   :  { %v1688_v2 = vpop.eup %1687 }
 0x45a   :  { %v1972_v3 = vpop.eup %1689  ;;  %v671_v4 = vsel %vm601_vm12, %v1688_v2, 0.0 }
 0x45b   :  { %v1692_v5 = vpop.eup %1691  ;;  %672 = vadd.xlane.f32.xlu1 %v671_v4  ;;  %v665_v8 = vsel %vm601_vm12, %v1972_v3, 0.0 }
 0x45c   :  { %v668_v6 = vsel %vm601_vm12, %v1692_v5, 0.0  ;;  %v1694_v7 = vpop.eup %1693 }
 0x45d   :  { %669 = vadd.xlane.f32.xlu0 %v668_v6  ;;  %v662_v9 = vsel %vm601_vm12, %v1694_v7, 0.0 }
 0x45f   :  { %666 = vadd.xlane.f32.xlu1 %v665_v8 }
 0x461   :  { %663 = vadd.xlane.f32.xlu0 %v662_v9 }
 0x470   :  { %951 = vrot.lane.b32.xlu1 %v1888_v44, %s1746_s19 }
 0x477   :  { %864 = vrot.lane.b32.xlu0 %v1877_v40, %s1746_s19 }
 0x482   :  { %v652_v11 = vpop.xlane.xlu0 %651 }
 0x483   :  { %1695 = vrcp.f32 %v652_v11 }
 0x488   :  { %v655_v13 = vpop.xlane.xlu1 %654 }
 0x489   :  { %1697 = vrcp.f32 %v655_v13 }
 0x490   :  { %v1696_v14 = vpop.eup %1695 }
 0x491   :  { %v682_v15 = vmul.f32 %v1696_v14, %v1959_v32 }
 0x493   :  { %1583 = vmatprep.mubr.msk.f32.mxu1 %vm601_vm12, %v682_v15 }
 0x496   :  { %v1698_v16 = vpop.eup %1697 }
 0x497   :  { %v683_v17 = vmul.f32 %v1698_v16, %v1963_v34 }
 0x499   :  { %1584 = vmatmul.mubr.msk.f32.vlgmr.msra.gmra.mxu1 %vm601_vm12, %v683_v17 }
 0x49a   :  { %1587 = vmatpush3.msra.mxu1 %v780_v61 }
 0x49b   :  { %1588 = vmatprep.subr.mxu1 %v778_v10 }
 0x49c   :  { %1589 = vmatpush3.msra.mxu1 %v778_v10 }
 0x49d   :  { %1600 = vmatprep.subr.mxu1 %v954_v12 }
 0x4d8   :  { %v661_v40 = vpop.xlane.xlu1 %660 }
 0x4d9   :  { %1699 = vrcp.f32 %v661_v40 }
 0x4dc   :  { %v658_v44 = vpop.xlane.xlu0 %657 }
 0x4dd   :  { %1701 = vrcp.f32 %v658_v44  ;;  %v1210_v44 = vld [vmem:[%s2114_s8 + $0x18] sm:$0xff] }
 0x4e4   :  { %v673_v18 = vpop.xlane.xlu1 %672 }
 0x4e5   :  { %1703 = vrcp.f32 %v673_v18  ;;  %v1209_v18 = vld [vmem:[%s2114_s8 + $0x10] sm:$0xff] }
 0x4e6   :  { %v670_v19 = vpop.xlane.xlu0 %669  ;;  %v1700_v21 = vpop.eup %1699 }
 0x4e7   :  { %1705 = vrcp.f32 %v670_v19  ;;  %v685_v25 = vmul.f32 %v1700_v21, %v1967_v57  ;;  %v1208_v19 = vld [vmem:[%s2114_s8 + $0x8] sm:$0xff] }
 0x4e8   :  { %v667_v20 = vpop.xlane.xlu1 %666 }
 0x4e9   :  { %1707 = vrcp.f32 %v667_v20  ;;  %v1207_v20 = vld [vmem:[%s2114_s8] sm:$0xff] }
 0x4ea   :  { %v1702_v22 = vpop.eup %1701  ;;  %v664_v23 = vpop.xlane.xlu0 %663 }
 0x4eb   :  { %1709 = vrcp.f32 %v664_v23  ;;  %v684_v24 = vmul.f32 %v1702_v22, %v1686_v60 }
 0x4ec   :  { %v952_v27 = vpop.permute.xlu1 %951 }
 0x4ed   :  { %1590 = vmatprep.mubr.msk.f32.mxu1 %vm601_vm12, %v684_v24 }
 0x4ee   :  { %1591 = vmatmul.mubr.msk.f32.vlgmr.msra.gmra.mxu1 %vm601_vm12, %v685_v25  ;;  %v865_v26 = vpop.permute.xlu0 %864 }
 0x4ef   :  { %1601 = vmatpush3.msra.mxu1 %v954_v12  ;;  %1595 = vmatprep.subr.mxu0 %v865_v26 }
 0x4f0   :  { %1602 = vmatprep.subr.mxu1 %v952_v27  ;;  %1596 = vmatpush3.msra.mxu0 %v865_v26 }
 0x4f1   :  { %1603 = vmatpush3.msra.mxu1 %v952_v27  ;;  %1607 = vmatprep.subr.mxu0 %v1072_v41 }
 0x4f2   :  { %v1704_v28 = vpop.eup %1703  ;;  %1618 = vmatprep.subr.mxu1 %v1210_v44 }
 0x4f3   :  { %v689_v31 = vmul.f32 %v1704_v28, %v1688_v2  ;;  %v1466_v28 = vld [vmem:[%s2112_s6] ss:$0 sm:$0xff] }
 0x4f4   :  { %v1706_v29 = vpop.eup %1705 }
 0x4f5   :  { %v688_v30 = vmul.f32 %v1706_v29, %v1692_v5 }
 0x4f6   :  { %v1708_v32 = vpop.eup %1707 }
 0x4f7   :  { %1604 = vmatprep.mubr.msk.f32.mxu1 %vm601_vm12, %v688_v30  ;;  %v687_v35 = vmul.f32 %v1708_v32, %v1972_v3  ;;  %v1467_v30 = vld [vmem:[%s2113_s7] ss:$0 sm:$0xff] }
 0x4f8   :  { %v1710_v33 = vpop.eup %1709  ;;  %1605 = vmatmul.mubr.msk.f32.vlgmr.msra.gmra.mxu1 %vm601_vm12, %v689_v31 }
 0x4f9   :  { %v686_v34 = vmul.f32 %v1710_v33, %v1694_v7  ;;  %1619 = vmatpush3.msra.mxu1 %v1210_v44 }
 0x4fa   :  { %1620 = vmatprep.subr.mxu1 %v1209_v18 }
 0x4fb   :  { %1597 = vmatprep.mubr.msk.f32.mxu0 %vm601_vm12, %v686_v34  ;;  %1621 = vmatpush3.msra.mxu1 %v1209_v18 }
 0x4fc   :  { %1598 = vmatmul.mubr.msk.f32.vlgmr.msra.gmra.mxu0 %vm601_vm12, %v687_v35  ;;  %1622 = vmatprep.subr.mxu1 %v1208_v19 }
 0x4fd   :  { %1608 = vmatpush3.msra.mxu0 %v1072_v41  ;;  %1623 = vmatpush3.msra.mxu1 %v1208_v19  ;;  %v1329_v41 = vld [vmem:[%s2116_s10 + $0x60] sm:$0xff] }
 0x4fe   :  { %1609 = vmatprep.subr.mxu0 %v1071_v42  ;;  %1624 = vmatprep.subr.mxu1 %v1207_v20 }
 0x4ff   :  { %1610 = vmatpush3.msra.mxu0 %v1071_v42  ;;  %1625 = vmatpush3.msra.mxu1 %v1207_v20  ;;  %v1328_v42 = vld [vmem:[%s2116_s10 + $0x58] sm:$0xff] }
 0x500   :  { %1611 = vmatprep.subr.mxu0 %v1070_v43 }
 0x501   :  { %1612 = vmatpush3.msra.mxu0 %v1070_v43  ;;  %v1327_v43 = vld [vmem:[%s2116_s10 + $0x50] sm:$0xff] }
 0x502   :  { %1613 = vmatprep.subr.mxu0 %v1069_v45 }
 0x503   :  { %1614 = vmatpush3.msra.mxu0 %v1069_v45  ;;  %v1326_v45 = vld [vmem:[%s2116_s10 + $0x48] sm:$0xff] }
 0x559   :  { %v1585_v36 = vpop.f32.mrf.mxu1 }
 0x55b   :  { %v768_v37 = vpop.f32.mrf.mxu1 }
 0x5ae   :  { %v1592_v38 = vpop.f32.mrf.mxu1 }
 0x5af   :  { %1042 = vrot.lane.b32.xlu1 %v1592_v38, %s1747_s20  ;;  %v1331_v38 = vld [vmem:[%s2116_s10 + $0x70] sm:$0xff] }
 0x5b0   :  { %v855_v39 = vpop.f32.mrf.mxu1 }
 0x5b1   :  { %1040 = vrot.lane.b32.xlu0 %v855_v39, %s1747_s20  ;;  %v1330_v39 = vld [vmem:[%s2116_s10 + $0x68] sm:$0xff] }
 0x5b8   :  { %v1606_v47 = vpop.f32.mrf.mxu1 }
 0x5ba   :  { %v1029_v49 = vpop.f32.mrf.mxu1 }
 0x5bc   :  { %v1599_v46 = vpop.f32.mrf.mxu0 }
 0x5bd   :  { %1050 = vrot.lane.b32.xlu1 %v1599_v46, %s1748_s28  ;;  %v1325_v46 = vld [vmem:[%s2116_s10 + $0x40] sm:$0xff] }
 0x5be   :  { %v942_v48 = vpop.f32.mrf.mxu0 }
 0x5bf   :  { %1048 = vrot.lane.b32.xlu0 %v942_v48, %s1748_s28  ;;  %v1323_v48 = vld [vmem:[%s2116_s10 + $0x30] sm:$0xff]  ;;  %s1719_s28 = scalar_lea.vmem %s1425_s27, 256 }
 0x5c0   :  { %p1720_p0 = scmp.ne.s32.totalorder %s1425_s27, %s1719_s28  ;;  %p1725_p2 = scmp.lt.s32.totalorder %s1719_s28, %s1719_s28 }
 0x5c1   :  { %1058 = vrot.lane.b32.xlu1 %v1606_v47, %s1749_s29  ;;  %v1324_v47 = vld [vmem:[%s2116_s10 + $0x38] sm:$0xff] }
 0x5c2   :  { %p1726_p3 = por %p1725_p2, %p1724_p1 }
 0x5c3   :  { %1056 = vrot.lane.b32.xlu0 %v1029_v49, %s1749_s29  ;;  %v1322_v49 = vld [vmem:[%s2116_s10 + $0x28] sm:$0xff] }
 0x5c4   :  { %p1727_p4 = pnand %p1726_p3, %p1720_p0 }
 0x621   :  { %v1043_v50 = vpop.permute.xlu1 %1042 }
 0x622   :  { %v1063_v56 = vsel %vm244_vm1, %v1585_v36, %v1043_v50  ;;  %v1321_v50 = vld [vmem:[%s2116_s10 + $0x20] sm:$0xff] }
 0x623   :  { %v1041_v51 = vpop.permute.xlu0 %1040 }
 0x624   :  { %v1062_v54 = vsel %vm244_vm1, %v768_v37, %v1041_v51  ;;  %v1332_v37 = vld [vmem:[%s2116_s10 + $0x78] sm:$0xff] }
 0x625   :  { %1629 = vmatprep.subr.mxu0 %v1332_v37  ;;  %v1320_v51 = vld [vmem:[%s2116_s10 + $0x18] sm:$0xff] }
 0x62f   :  { %v1051_v52 = vpop.permute.xlu1 %1050 }
 0x630   :  { %v1065_v59 = vsel %vm601_vm12, %v1063_v56, %v1051_v52  ;;  %v1319_v52 = vld [vmem:[%s2116_s10 + $0x10] sm:$0xff] }
 0x631   :  { %v1049_v53 = vpop.permute.xlu0 %1048 }
 0x632   :  { %v1064_v57 = vsel %vm601_vm12, %v1062_v54, %v1049_v53  ;;  %v1318_v53 = vld [vmem:[%s2116_s10 + $0x8] sm:$0xff]  ;;  %v1317_v54 = vld [vmem:[%s2116_s10] sm:$0xff] }
 0x633   :  { %v1059_v55 = vpop.permute.xlu1 %1058 }
 0x634   :  { %v1068_v61 = vsel %vm1066_vm14, %v1065_v59, %v1059_v55  ;;  %v1468_v55 = vld [vmem:[%s2115_s9] ss:$0 sm:$0xff] }
 0x635   :  { %v1057_v58 = vpop.permute.xlu0 %1056 }
 0x636   :  { %v1067_v60 = vsel %vm1066_vm14, %v1064_v57, %v1057_v58 }
 0x637   :  { %1615 = vmatprep.mubr.msk.f32.mxu0 %vm46_vm0, %v1067_v60 }
 0x638   :  { %1616 = vmatmul.mubr.msk.f32.vlgmr.msra.gmra.mxu0 %vm46_vm0, %v1068_v61 }
 0x639   :  { %1630 = vmatpush3.msra.mxu0 %v1332_v37 }
 0x63a   :  { %1631 = vmatprep.subr.mxu0 %v1331_v38 }
 0x63b   :  { %1632 = vmatpush3.msra.mxu0 %v1331_v38 }
 0x63c   :  { %1633 = vmatprep.subr.mxu0 %v1330_v39 }
 0x63d   :  { %1634 = vmatpush3.msra.mxu0 %v1330_v39 }
 0x63e   :  { %1635 = vmatprep.subr.mxu0 %v1329_v41 }
 0x63f   :  { %1636 = vmatpush3.msra.mxu0 %v1329_v41 }
 0x640   :  { %1637 = vmatprep.subr.mxu0 %v1328_v42 }
 0x641   :  { %1638 = vmatpush3.msra.mxu0 %v1328_v42 }
 0x642   :  { %1639 = vmatprep.subr.mxu0 %v1327_v43 }
 0x643   :  { %1640 = vmatpush3.msra.mxu0 %v1327_v43 }
 0x644   :  { %1641 = vmatprep.subr.mxu0 %v1326_v45 }
 0x645   :  { %1642 = vmatpush3.msra.mxu0 %v1326_v45 }
 0x646   :  { %1643 = vmatprep.subr.mxu0 %v1325_v46 }
 0x647   :  { %1644 = vmatpush3.msra.mxu0 %v1325_v46 }
 0x648   :  { %1645 = vmatprep.subr.mxu0 %v1324_v47 }
 0x649   :  { %1646 = vmatpush3.msra.mxu0 %v1324_v47 }
 0x64a   :  { %1647 = vmatprep.subr.mxu0 %v1323_v48 }
 0x64b   :  { %1648 = vmatpush3.msra.mxu0 %v1323_v48 }
 0x64c   :  { %1649 = vmatprep.subr.mxu0 %v1322_v49 }
 0x64d   :  { %1650 = vmatpush3.msra.mxu0 %v1322_v49 }
 0x64e   :  { %1651 = vmatprep.subr.mxu0 %v1321_v50 }
 0x64f   :  { %1652 = vmatpush3.msra.mxu0 %v1321_v50 }
 0x650   :  { %1653 = vmatprep.subr.mxu0 %v1320_v51 }
 0x651   :  { %1654 = vmatpush3.msra.mxu0 %v1320_v51 }
 0x652   :  { %1655 = vmatprep.subr.mxu0 %v1319_v52 }
 0x653   :  { %1656 = vmatpush3.msra.mxu0 %v1319_v52 }
 0x654   :  { %1657 = vmatprep.subr.mxu0 %v1318_v53 }
 0x655   :  { %1658 = vmatpush3.msra.mxu0 %v1318_v53 }
 0x656   :  { %1659 = vmatprep.subr.mxu0 %v1317_v54 }
 0x657   :  { %1660 = vmatpush3.msra.mxu0 %v1317_v54 }
 0x6f8   :  { %v1617_v63 = vpop.f32.mrf.mxu0 }
 0x6f9   :  { %v1158_v2 = vadd.f32 %v1617_v63, %v1463_v62 }
 0x6fa   :  { %v1152_v3 = vpop.f32.mrf.mxu0 }
 0x6fb   :  { %v1153_v4 = vadd.f32 %v1463_v62, %v1152_v3  ;;  %v1162_v5 = vadd.f32 %v1158_v2, %v1825_v1 }
 0x6fd   :  { %v1168_v6 = vsel %vm46_vm0, %v1162_v5, 0.0  ;;  %v1161_v7 = vadd.f32 %v1153_v4, %v1820_v0 }
 0x6fe   :  { %1169 = vadd.xlane.f32.xlu1 %v1168_v6 }
 0x6ff   :  { %v1165_v8 = vsel %vm46_vm0, %v1161_v7, 0.0 }
 0x700   :  { %1166 = vadd.xlane.f32.xlu0 %v1165_v8 }
 0x787   :  { %v1170_v9 = vpop.xlane.xlu1 %1169 }
 0x788   :  { %v1172_v10 = vmul.f32 0.03125, %v1170_v9 }
 0x789   :  { %v1167_v11 = vpop.xlane.xlu0 %1166 }
 0x78a   :  { %v1171_v12 = vmul.f32 0.03125, %v1167_v11  ;;  %v1174_v13 = vsub.f32 %v1162_v5, %v1172_v10 }
 0x78c   :  { %v1173_v14 = vsub.f32 %v1161_v7, %v1171_v12  ;;  %v1176_v17 = vmul.f32 %v1174_v13, %v1174_v13 }
 0x78e   :  { %v1175_v15 = vmul.f32 %v1173_v14, %v1173_v14  ;;  %v1180_v40 = vsel %vm46_vm0, %v1176_v17, 0.0 }
 0x790   :  { %v1177_v16 = vsel %vm46_vm0, %v1175_v15, 0.0 }
 0x791   :  { %1178 = vadd.xlane.f32.xlu0 %v1177_v16  ;;  %v1471_v16 = vld [vmem:[%s2117_s11] ss:$0 sm:$0xff] }
 0x795   :  { %1181 = vadd.xlane.f32.xlu0 %v1180_v40 }
 0x81a   :  { %v1179_v21 = vpop.xlane.xlu0 %1178 }
 0x81b   :  { %v1183_v22 = vmul.f32 0.03125, %v1179_v21 }
 0x81d   :  { %v1185_v23 = vadd.f32 1e-05, %v1183_v22 }
 0x81e   :  { %v1182_v24 = vpop.xlane.xlu0 %1181 }
 0x81f   :  { %1711 = vrsqrt.f32 %v1185_v23  ;;  %v1184_v25 = vmul.f32 0.03125, %v1182_v24 }
 0x821   :  { %v1186_v26 = vadd.f32 1e-05, %v1184_v25 }
 0x823   :  { %1713 = vrsqrt.f32 %v1186_v26 }
 0x82c   :  { %v1712_v27 = vpop.eup %1711 }
 0x82d   :  { %v1189_v29 = vmul.f32 %v1712_v27, %v1173_v14 }
 0x82f   :  { %v1197_v31 = vmul.f32 %v1466_v28, %v1189_v29 }
 0x830   :  { %v1714_v32 = vpop.eup %1713 }
 0x831   :  { %v1190_v33 = vmul.f32 %v1714_v32, %v1174_v13  ;;  %v1205_v34 = vadd.f32 %v1467_v30, %v1197_v31 }
 0x833   :  { %v1198_v35 = vmul.f32 %v1466_v28, %v1190_v33  ;;  %1626 = vmatprep.mubr.msk.f32.mxu1 %vm46_vm0, %v1205_v34 }
 0x835   :  { %v1206_v36 = vadd.f32 %v1467_v30, %v1198_v35 }
 0x837   :  { %1627 = vmatmul.mubr.msk.f32.vlgmr.msra.gmra.mxu1 %vm46_vm0, %v1206_v36 }
 0x8f7   :  { %v1628_v56 = vpop.f32.mrf.mxu1 }
 0x8f8   :  { %v1296_v57 = vadd.f32 %v1628_v56, %v1468_v55 }
 0x8f9   :  { %v1290_v58 = vpop.f32.mrf.mxu1 }
 0x8fa   :  { %v1302_v59 = vmul.f32 0.044715, %v1296_v57  ;;  %v1291_v60 = vadd.f32 %v1468_v55, %v1290_v58  ;;  %v1300_v13 = vmul.f32 0.5, %v1296_v57 }
 0x8fc   :  { %v1304_v61 = vmul.f32 %v1302_v59, %v1296_v57  ;;  %v1301_v62 = vmul.f32 0.044715, %v1291_v60  ;;  %v1299_v11 = vmul.f32 0.5, %v1291_v60 }
 0x8fe   :  { %v1306_v63 = vmul.f32 %v1304_v61, %v1296_v57  ;;  %v1303_v2 = vmul.f32 %v1301_v62, %v1291_v60 }
 0x900   :  { %v1308_v3 = vadd.f32 %v1306_v63, %v1296_v57  ;;  %v1305_v4 = vmul.f32 %v1303_v2, %v1291_v60 }
 0x902   :  { %v1307_v5 = vadd.f32 %v1305_v4, %v1291_v60  ;;  %v1310_v6 = vmul.f32 0.7978846, %v1308_v3 }
 0x904   :  { %v1309_v7 = vmul.f32 0.7978846, %v1307_v5  ;;  %1715 = vtanh.f32 %v1310_v6 }
 0x906   :  { %1717 = vtanh.f32 %v1309_v7 }
 0x911   :  { %v1716_v8 = vpop.eup %1715 }
 0x912   :  { %v1314_v10 = vadd.f32 1.0, %v1716_v8 }
 0x913   :  { %v1718_v9 = vpop.eup %1717 }
 0x914   :  { %v1313_v12 = vadd.f32 1.0, %v1718_v9  ;;  %v1316_v15 = vmul.f32 %v1314_v10, %v1300_v13 }
 0x916   :  { %v1315_v14 = vmul.f32 %v1313_v12, %v1299_v11 }
 0x918   :  { %1661 = vmatprep.mubr.f32.mxu0 %v1315_v14 }
 0x919   :  { %1662 = vmatmul.mubr.f32.vlgmr.msra.gmra.mxu0 %v1316_v15 }
 0x9d9   :  { %v1663_v17 = vpop.f32.mrf.mxu0 }
 0x9da   :  { %v1412_v40 = vadd.f32 %v1663_v17, %v1471_v16 }
 0x9db   :  { %v1406_v44 = vpop.f32.mrf.mxu0 }
 0x9dc   :  { %v1416_v18 = vadd.f32 %v1412_v40, %v1825_v1  ;;  %v1407_v19 = vadd.f32 %v1471_v16, %v1406_v44 }
 0x9de   :  { %1418 = vst.msk [vmem:[#allocation2 + $0x8] sm:$0xff] %vm46_vm0, %v1416_v18  ;;  %v1415_v20 = vadd.f32 %v1407_v19, %v1820_v0 }
 0x9e0   :  { %1417 = vst.msk [vmem:[#allocation2] sm:$0xff] %vm46_vm0, %v1415_v20 }
 0x9e1   :  { %1730 = shalt.err (!%p1727_p4)
}
 0x9e2   :  { %s1751_s11 = smov 128  }
 0x9e3   :  { %1430 = dma.vmem_to_hbm [thread:$0]  %s1425_s27, 256, %s2118_s12, [#allocation3], %s1751_s11, %s1751_s11, %s1747_s20  }
 0x9e4   :  { %1739 = dma.done.wait [#allocation3], 256  }
 0x9e5   :  { %1740 = vsyncadd [#allocation3], 4294967040 }
 0x9e6   :  { %1434 = vsyncpa [#allocation3], 1 }

</bundles_post_ra>
